<compile_context>
chip_gen: v7x
topology: tpu7x:2x2x1
jax: 0.10.0
libtpu: 0.0.40
codegen_flags: <defaults>
</compile_context>

<pallas_src>
import jax
import jax.numpy as jnp
from jax.experimental import pallas as pl
from jax.experimental.pallas import tpu as pltpu


def _round_up(n, m):
    return (n + m - 1) // m * m


def _gelu_tanh(x):
    """tanh-approx GELU: 0.5*x*(1 + tanh(sqrt(2/pi)*(x + 0.044715*x^3)))."""
    c = 0.7978845608028654  # sqrt(2/pi)
    u = c * (x + 0.044715 * x * x * x)
    return 0.5 * x * (1.0 + jnp.tanh(u))


def _discriminator_kernel(x_ref, w1_ref, b1_ref, w2_ref, b2_ref, out_ref):
    # x_ref : (tm, H)  token tile (streamed, original dtype; cast here)
    # w1_ref: (H, H)   bf16 dense weight, (in, out) layout (resident VMEM)
    # b1_ref: (1, H)   f32 dense bias (resident VMEM)
    # w2_ref: (1, H)   f32 dense_prediction weight row (resident VMEM)
    # b2_ref: (1, 1)   f32 dense_prediction bias (SMEM scalar)
    # out   : (tm, 1)  f32 per-token logits

    # dense: bf16 x bf16 matmul on the MXU, f32 accumulation.  The bf16 cast
    # of x is a VPU op hidden under the MXU work.
    x_bf = x_ref[...].astype(jnp.bfloat16)
    h = jnp.dot(x_bf, w1_ref[...], preferred_element_type=jnp.float32)
    h = _gelu_tanh(h + b1_ref[...])

    # dense_prediction: VPU multiply + XLU lane reduction (no padded matmul).
    logits = jnp.sum(h * w2_ref[...], axis=-1, keepdims=True) + b2_ref[0, 0]
    out_ref[...] = logits.astype(out_ref.dtype)


def _vmem_limit_bytes():
    """~75% of this generation's per-core VMEM (leave Mosaic scratch headroom)."""
    cap = 64 * 1024 * 1024  # conservative fallback (v7x-sized)
    try:
        info = pltpu.get_tpu_info()
        cap = getattr(info, "vmem_capacity_bytes", cap)
    except Exception:
        pass
    return int(cap * 3 // 4)


def discriminator_forward(x, w1, b1, w2, b2, *, tm=1024):
    """x: (batch, seq, hidden) -> logits (batch, seq) f32.

    w1: (hidden, hidden) stored as (in, out); b1: (hidden,);
    w2: (hidden, 1); b2: (1,).
    """
    B, S, H = x.shape
    M = B * S

    # Clamp the token tile for small problems (multiple of 8); for mid-size
    # problems that would fit in a single step, split so the grid has >= 2
    # "parallel" steps (megacore).  No wrapper-side padding: the grid uses
    # cdiv and Pallas handles the ragged last block.
    tm = min(tm, _round_up(M, 8))
    if M > 256 and pl.cdiv(M, tm) < 2:
        tm = _round_up(pl.cdiv(M, 2), 128)

    x2d = x.reshape(M, H)                                 # free view, no HBM pass
    w1_bf = w1.astype(jnp.bfloat16)                       # one-time H*H cast
    b1_2d = b1.reshape(1, H).astype(jnp.float32)
    w2_row = w2.reshape(1, H).astype(jnp.float32)         # kept f32 (VPU path)
    b2_2d = b2.reshape(1, 1).astype(jnp.float32)

    grid = (pl.cdiv(M, tm),)

    cost = pl.CostEstimate(
        flops=2 * M * H * H + 2 * M * H,
        transcendentals=M * H,                            # one tanh per element
        bytes_accessed=(M * H * x.dtype.itemsize          # x streamed as-is
                        + H * H * 2                       # resident bf16 W1
                        + H * 8                           # b1 + w2 rows
                        + M * 4 + 4),                     # logits + b2
    )

    out = pl.pallas_call(
        _discriminator_kernel,
        out_shape=jax.ShapeDtypeStruct((M, 1), jnp.float32),
        grid_spec=pltpu.PrefetchScalarGridSpec(
            num_scalar_prefetch=0,
            grid=grid,
            in_specs=[
                pl.BlockSpec((tm, H), lambda i: (i, 0)),             # x (streamed)
                pl.BlockSpec(memory_space=pltpu.MemorySpace.VMEM),   # W1 resident
                pl.BlockSpec(memory_space=pltpu.MemorySpace.VMEM),   # b1 resident
                pl.BlockSpec(memory_space=pltpu.MemorySpace.VMEM),   # w2 resident
                pl.BlockSpec(memory_space=pltpu.MemorySpace.SMEM),   # b2 scalar
            ],
            out_specs=pl.BlockSpec((tm, 1), lambda i: (i, 0)),
        ),
        compiler_params=pltpu.CompilerParams(
            dimension_semantics=("parallel",),
            vmem_limit_bytes=_vmem_limit_bytes(),
        ),
        cost_estimate=cost,
    )(x2d, w1_bf, b1_2d, w2_row, b2_2d)

    # torch.squeeze(..., dim=-1)
    return out[:, 0].reshape(B, S)


def init_params(key, hidden_size):
    """Deterministic nn.Linear-style init (uniform +/- 1/sqrt(fan_in))."""
    k1, k2, k3, k4 = jax.random.split(key, 4)
    bound = 1.0 / jnp.sqrt(hidden_size)
    # Stored as (in, out) so the kernel does x @ W directly
    # (equivalent to torch's x @ weight.T with weight of shape (out, in)).
    w1 = jax.random.uniform(k1, (hidden_size, hidden_size), jnp.float32, -bound, bound)
    b1 = jax.random.uniform(k2, (hidden_size,), jnp.float32, -bound, bound)
    w2 = jax.random.uniform(k3, (hidden_size, 1), jnp.float32, -bound, bound)
    b2 = jax.random.uniform(k4, (1,), jnp.float32, -bound, bound)
    return w1, b1, w2, b2


if __name__ == "__main__":
    key = jax.random.PRNGKey(0)
    k_x, k_p = jax.random.split(key)

    batch, seq, hidden = 2, 8, 32
    x = jax.random.normal(k_x, (batch, seq, hidden), dtype=jnp.float32)
    w1, b1, w2, b2 = init_params(k_p, hidden)

    fwd = jax.jit(discriminator_forward)
    logits = fwd(x, w1, b1, w2, b2)
    jax.block_until_ready(logits)
    assert logits.shape == (batch, seq)

    # Reference with the module's semantics (exact-erf GELU), applying the
    # same bf16 cast to the MXU operands.  The kernel's tanh-approx GELU and
    # f32 accumulation stay well within the 5e-3 tolerance at this size.
    xf = x.reshape(-1, hidden).astype(jnp.bfloat16).astype(jnp.float32)
    w1f = w1.astype(jnp.bfloat16).astype(jnp.float32)
    h_ref = jax.nn.gelu(xf @ w1f + b1, approximate=False)
    ref = (h_ref @ w2 + b2).reshape(batch, seq)
    assert jnp.max(jnp.abs(logits - ref)) < 5e-3

    print("KERNEL_OK")
</pallas_src>

<mosaic_0001>
module attributes {stable_mosaic.version = 11 : i64} {
  func.func @_discriminator_kernel(%arg0: i32, %arg1: memref<16x32xf32, #tpu.memory_space<vmem>>, %arg2: memref<32x32xbf16, #tpu.memory_space<vmem>>, %arg3: memref<1x32xf32, #tpu.memory_space<vmem>>, %arg4: memref<1x32xf32, #tpu.memory_space<vmem>>, %arg5: memref<1x1xf32, #tpu.memory_space<smem>>, %arg6: memref<16x1xf32, #tpu.memory_space<vmem>>) attributes {dimension_semantics = [#tpu.dimension_semantics<parallel>], iteration_bounds = array<i64: 1>, scalar_prefetch = 0 : i64, scratch_operands = 0 : i64, tpu.core_type = #tpu.core_type<tc>, window_params = [{transform_indices = @transform_0, window_bounds = array<i64: 16, 32>}, {pipeline_mode = #tpu.pipeline_mode<synchronous>, transform_indices = @transform_1, window_bounds = array<i64: 32, 32>}, {pipeline_mode = #tpu.pipeline_mode<synchronous>, transform_indices = @transform_2, window_bounds = array<i64: 1, 32>}, {pipeline_mode = #tpu.pipeline_mode<synchronous>, transform_indices = @transform_3, window_bounds = array<i64: 1, 32>}, {transform_indices = @transform_4, window_bounds = array<i64: 1, 1>}, {transform_indices = @transform_5, window_bounds = array<i64: 16, 1>}]} {
    %c0 = arith.constant 0 : index
    %c0_0 = arith.constant 0 : index
    %0 = vector.load %arg1[%c0, %c0_0] : memref<16x32xf32, #tpu.memory_space<vmem>>, vector<16x32xf32>
    %1 = arith.truncf %0 : vector<16x32xf32> to vector<16x32xbf16>
    %c0_1 = arith.constant 0 : index
    %c0_2 = arith.constant 0 : index
    %2 = vector.load %arg2[%c0_1, %c0_2] : memref<32x32xbf16, #tpu.memory_space<vmem>>, vector<32x32xbf16>
    %cst = arith.constant dense<0.000000e+00> : vector<16x32xf32>
    %3 = tpu.matmul %1, %2, %cst {dimension_numbers = #tpu.dot_dimension_numbers<[1], [0], [0], [1], [0, 0, 1, 1], [], []>} : vector<16x32xbf16>, vector<32x32xbf16>, vector<16x32xf32> -> vector<16x32xf32>
    %c0_3 = arith.constant 0 : index
    %c0_4 = arith.constant 0 : index
    %4 = vector.load %arg3[%c0_3, %c0_4] : memref<1x32xf32, #tpu.memory_space<vmem>>, vector<1x32xf32>
    %5 = vector.broadcast %4 : vector<1x32xf32> to vector<16x32xf32>
    %6 = arith.addf %3, %5 : vector<16x32xf32>
    %cst_5 = arith.constant 4.471500e-02 : f32
    %7 = vector.broadcast %cst_5 : f32 to vector<16x32xf32>
    %8 = arith.mulf %7, %6 : vector<16x32xf32>
    %9 = arith.mulf %8, %6 : vector<16x32xf32>
    %10 = arith.mulf %9, %6 : vector<16x32xf32>
    %11 = arith.addf %6, %10 : vector<16x32xf32>
    %cst_6 = arith.constant 0.797884583 : f32
    %12 = vector.broadcast %cst_6 : f32 to vector<16x32xf32>
    %13 = arith.mulf %12, %11 : vector<16x32xf32>
    %cst_7 = arith.constant 5.000000e-01 : f32
    %14 = vector.broadcast %cst_7 : f32 to vector<16x32xf32>
    %15 = arith.mulf %14, %6 : vector<16x32xf32>
    %16 = math.tanh %13 : vector<16x32xf32>
    %cst_8 = arith.constant 1.000000e+00 : f32
    %17 = vector.broadcast %cst_8 : f32 to vector<16x32xf32>
    %18 = arith.addf %17, %16 : vector<16x32xf32>
    %19 = arith.mulf %15, %18 : vector<16x32xf32>
    %c0_9 = arith.constant 0 : index
    %c0_10 = arith.constant 0 : index
    %20 = vector.load %arg4[%c0_9, %c0_10] : memref<1x32xf32, #tpu.memory_space<vmem>>, vector<1x32xf32>
    %21 = vector.broadcast %20 : vector<1x32xf32> to vector<16x32xf32>
    %22 = arith.mulf %19, %21 : vector<16x32xf32>
    %cst_11 = arith.constant dense<0.000000e+00> : vector<16xf32>
    %23 = vector.multi_reduction <add>, %22, %cst_11 [1] : vector<16x32xf32> to vector<16xf32>
    %24 = vector.shape_cast %23 : vector<16xf32> to vector<16x1xf32>
    %c0_12 = arith.constant 0 : index
    %c0_13 = arith.constant 0 : index
    %25 = memref.load %arg5[%c0_12, %c0_13] : memref<1x1xf32, #tpu.memory_space<smem>>
    %26 = vector.broadcast %25 : f32 to vector<16x1xf32>
    %27 = arith.addf %24, %26 : vector<16x1xf32>
    %c0_14 = arith.constant 0 : index
    %c0_15 = arith.constant 0 : index
    %28 = vector.load %arg6[%c0_14, %c0_15] : memref<16x1xf32, #tpu.memory_space<vmem>>, vector<16x1xf32>
    tpu.vector_store %arg6[%c0_14, %c0_15], %27 {strides = array<i32>} : memref<16x1xf32, #tpu.memory_space<vmem>>, vector<16x1xf32>,
    return
  }
  func.func @transform_0(%arg0: i32) -> (i32, i32) {
    %c0_i32 = arith.constant 0 : i32
    %c0_i32_0 = arith.constant 0 : i32
    return %arg0, %c0_i32 : i32, i32
  }
  func.func @transform_1(%arg0: i32) -> (i32, i32) {
    %c0_i32 = arith.constant 0 : i32
    %c0_i32_0 = arith.constant 0 : i32
    %c0_i32_1 = arith.constant 0 : i32
    return %c0_i32, %c0_i32_0 : i32, i32
  }
  func.func @transform_2(%arg0: i32) -> (i32, i32) {
    %c0_i32 = arith.constant 0 : i32
    %c0_i32_0 = arith.constant 0 : i32
    %c0_i32_1 = arith.constant 0 : i32
    return %c0_i32, %c0_i32_0 : i32, i32
  }
  func.func @transform_3(%arg0: i32) -> (i32, i32) {
    %c0_i32 = arith.constant 0 : i32
    %c0_i32_0 = arith.constant 0 : i32
    %c0_i32_1 = arith.constant 0 : i32
    return %c0_i32, %c0_i32_0 : i32, i32
  }
  func.func @transform_4(%arg0: i32) -> (i32, i32) {
    %c0_i32 = arith.constant 0 : i32
    %c0_i32_0 = arith.constant 0 : i32
    %c0_i32_1 = arith.constant 0 : i32
    return %c0_i32, %c0_i32_0 : i32, i32
  }
  func.func @transform_5(%arg0: i32) -> (i32, i32) {
    %c0_i32 = arith.constant 0 : i32
    %c0_i32_0 = arith.constant 0 : i32
    return %arg0, %c0_i32 : i32, i32
  }
}

</mosaic_0001>

<bundles_post_ra>
// kernel: squeeze.1
= control target key start
LH: loop header
LB: loop body
LE: loop exit
PB: predicated region body
PF: predicated region fallthrough
CT: control target
= control target key end

     0   :  { %s85_s0 = inlined_call_operand.vmem [shape: f32[16], index: 0, kind: input, shape index: {}]   ;;  %s86_s1 = inlined_call_operand.hbm [shape: f32[2,8], index: 1, kind: output, shape index: {}]  }
   0x1   :  { %v5_v0 = vld [vmem:[%s85_s0] sm:$0x1] }
   0x2   :  { %2 = vsyncpa [#allocation1], 0  ;;  %6 = vst [vmem:[#allocation3] sm:$0x1] %v5_v0  ;;  %vm8_vm0 = vcmask 64512   ;;  %s58_s0 = smov 120  }
   0x3   :  { %s59_s8 = smov [#allocation0]  }
   0x4   :  { %s26_s9 = sshll.u32 %s59_s8, 4  ;;  %s27_s9 = int_to_ptr.vmem [resolvable:$true] %s26_s9 }
   0x5   :  { %s34_s10 = scalar_lea.vmem %s27_s9, 32  ;;  %p39_p1 = scmp.lt.s32.totalorder %s27_s9, %s27_s9 }
   0x6   :  { %p35_p0 = scmp.ne.s32.totalorder %s27_s9, %s34_s10  ;;  %p40_p2 = scmp.lt.s32.totalorder %s34_s10, %s34_s10 }
   0x8   :  { %p41_p3 = por %p40_p2, %p39_p1 }
   0x9   :  { %v10_v1 = vld [vmem:[#allocation3] sm:$0x1]  }
   0xa   :  { %v7_v2 = vld [vmem:[#allocation3] sm:$0x1]   ;;  %11 = vrot.lane.b32.xlu0 %v10_v1, %s58_s0  ;;  %p42_p4 = pnand %p41_p3, %p35_p0 }
   0xb   :  { %9 = vst.msk [vmem:[#allocation2] sm:$0x1] %vm8_vm0, %v7_v2  }
  0x7c   :  { %v12_v3 = vpop.permute.xlu0 %11  }
  0x7d   :  { %15 = vst.msk [vmem:[#allocation2 + $0x1] sm:$0x1] %vm8_vm0, %v12_v3  }
  0x84   :  { %v19_v4 = vld [vmem:[#allocation2] sm:$0x3] }
  0x85   :  { %21 = vst [vmem:[#allocation0] sm:$0x3] %v19_v4 }
  0x86   :  { %45 = shalt.err (!%p42_p4)
}
  0x87   :  { %s46_s13 = scalar_lea.hbm %s86_s1, 32 }
  0x88   :  { %p47_p5 = scmp.ne.s32.totalorder %s86_s1, %s46_s13  ;;  %p50_p6 = scmp.lt.u32.totalorder %s46_s13, %s86_s1 }
  0x8a   :  { %p52_p7 = pnand %p50_p6, %p47_p5 }
  0x8c   :  { %55 = shalt.err (!%p52_p7)
}
  0x8d   :  { %29 = dma.vmem_to_hbm [thread:$0]  %s27_s9, 32, %s86_s1, [#allocation1]  }
  0x8e   :  { %56 = dma.done.wait [#allocation1], 32  }
  0x8f   :  { %57 = vsyncadd [#allocation1], 4294967264 }
  0x90   :  { %31 = vsyncpa [#allocation1], 1 }

// kernel: discriminator_forward.1
= control target key start
LH: loop header
LB: loop body
LE: loop exit
PB: predicated region body
PF: predicated region fallthrough
CT: control target
= control target key end

     0   :  { %v161_v0 = vmov 0.0   ;;  %vm162_vm0 = vmmov 0   ;;  %vm48_vm1 = vcmask 261120   ;;  %vm130_vm2 = vcmask 7168   ;;  %s223_s1 = inlined_call_operand.vmem [shape: bf16[32,32], index: 1, kind: input, shape index: {}]   ;;  %s224_s0 = inlined_call_operand.vmem [shape: f32[16,32], index: 0, kind: input, shape index: {}]   ;;  %s225_s2 = inlined_call_operand.vmem [shape: f32[1,32], index: 2, kind: input, shape index: {}]   ;;  %s226_s3 = inlined_call_operand.vmem [shape: f32[1,32], index: 3, kind: input, shape index: {}]   ;;  %s227_s4 = inlined_call_operand.<no memory space> [shape: f32[1,1], index: 4, kind: input, shape index: {}]   ;;  %s228_s5 = inlined_call_operand.vmem [shape: f32[16,1], index: 5, kind: output, shape index: {}]  }
   0x1   :  { %145 = vmatprep.subr.bf16.mxu0 %v161_v0  ;;  %v155_v1 = vld [vmem:[%s223_s1] sm:$0xff]   ;;  %149 = vmatprep.mubr.msk.bf16.mxu0 %vm162_vm0, %v161_v0  ;;  %v156_v2 = vld [vmem:[%s223_s1 + $0x8] sm:$0xff]   ;;  %v127_v36 = vstv %s227_s4 }
   0x2   :  { %146 = vmatpush3.bf16.msra.mxu0 %v155_v1  ;;  %v22_v3 = vld [vmem:[%s224_s0] sm:$0xff]  ;;  %v23_v4 = vld [vmem:[%s224_s0 + $0x8] sm:$0xff] }
   0x3   :  { %147 = vmatprep.subr.bf16.mxu0 %v161_v0  ;;  %v24_v5 = vpack.c.bf16 %v23_v4, %v22_v3  ;;  %v137_v6 = vld [vmem:[%s225_s2] ss:$0 sm:$0xff] }
   0x4   :  { %v141_v27 = vld [vmem:[%s226_s3] ss:$0 sm:$0xff] }
   0x6   :  { %148 = vmatpush3.bf16.msra.mxu0 %v156_v2 }
   0x9   :  { %150 = vmatmul.mubr.msk.bf16.vlgmr.msra.gmra.mrb[0].mxu0 %vm48_vm1, %v24_v5 }
  0xdc   :  { %v86_v7 = vpop.f32.mrb[0].mxu0 }
  0xdd   :  { %v87_v8 = vadd.f32 %v137_v6, %v86_v7  ;;  %v151_v9 = vpop.f32.mrb[1].mxu0 }
  0xde   :  { %v89_v10 = vpop.f32.mrb[2].mxu0 }
  0xdf   :  { %v93_v11 = vmul.f32 0.044715, %v87_v8  ;;  %v90_v12 = vadd.f32 %v137_v6, %v89_v10  ;;  %v152_v13 = vpop.f32.mrb[3].mxu0  ;;  %v103_v24 = vmul.f32 0.5, %v87_v8 }
  0xe1   :  { %v95_v14 = vmul.f32 %v93_v11, %v87_v8  ;;  %v94_v15 = vmul.f32 0.044715, %v90_v12  ;;  %v104_v29 = vmul.f32 0.5, %v90_v12 }
  0xe3   :  { %v96_v16 = vmul.f32 %v94_v15, %v90_v12  ;;  %v97_v17 = vmul.f32 %v95_v14, %v87_v8 }
  0xe5   :  { %v99_v18 = vadd.f32 %v97_v17, %v87_v8  ;;  %v98_v19 = vmul.f32 %v96_v16, %v90_v12 }
  0xe7   :  { %v101_v20 = vmul.f32 0.7978846, %v99_v18  ;;  %v100_v21 = vadd.f32 %v98_v19, %v90_v12 }
  0xe9   :  { %157 = vtanh.f32 %v101_v20  ;;  %v102_v22 = vmul.f32 0.7978846, %v100_v21 }
  0xeb   :  { %159 = vtanh.f32 %v102_v22 }
  0xf3   :  { %v158_v23 = vpop.eup %157 }
  0xf4   :  { %v107_v25 = vadd.f32 1.0, %v158_v23 }
  0xf5   :  { %v160_v26 = vpop.eup %159 }
  0xf6   :  { %v109_v28 = vmul.f32 %v107_v25, %v103_v24  ;;  %v108_v30 = vadd.f32 1.0, %v160_v26 }
  0xf8   :  { %v118_v31 = vmul.f32 %v141_v27, %v109_v28  ;;  %v110_v32 = vmul.f32 %v108_v30, %v104_v29 }
  0xfa   :  { %v120_v33 = vsel %vm48_vm1, %v118_v31, 0.0  ;;  %v119_v34 = vmul.f32 %v141_v27, %v110_v32 }
  0xfb   :  { %121 = vadd.xlane.f32.xlu0 %v120_v33 }
  0xfc   :  { %v123_v35 = vsel %vm48_vm1, %v119_v34, 0.0 }
  0xff   :  { %124 = vadd.xlane.f32.xlu0 %v123_v35 }
 0x188   :  { %v122_v37 = vpop.xlane.xlu0 %121 }
 0x189   :  { %v128_v38 = vadd.f32 %v127_v36, %v122_v37 }
 0x18b   :  { %131 = vst.msk [vmem:[%s228_s5] sm:$0xff] %vm130_vm2, %v128_v38 }
 0x18c   :  { %v125_v39 = vpop.xlane.xlu0 %124 }
 0x18d   :  { %v129_v40 = vadd.f32 %v127_v36, %v125_v39 }
 0x18f   :  { %132 = vst.msk [vmem:[%s228_s5 + $0x8] sm:$0xff] %vm130_vm2, %v129_v40 }

</bundles_post_ra>
